<compile_context>
chip_gen: v7x
topology: tpu7x:2x2x1
jax: 0.10.0
libtpu: 0.0.40
codegen_flags: <defaults>
</compile_context>

<pallas_src>
import functools

import numpy as np
import jax
import jax.numpy as jnp
from jax.experimental import pallas as pl
from jax.experimental.pallas import tpu as pltpu


def _pos_table_np(d_model: int, max_len: int) -> np.ndarray:
    """Exact re-implementation of the module's pos_table construction."""
    pos = np.arange(max_len, dtype=np.float64)[:, None]
    i = np.arange(d_model, dtype=np.float64)[None, :]
    table = pos / np.power(10000.0, 2.0 * i / d_model)
    table[0, :] = 0.0  # pos == 0 row is zeros before sin/cos
    table[1:, 0::2] = np.sin(table[1:, 0::2])
    table[1:, 1::2] = np.cos(table[1:, 1::2])
    return table.astype(np.float32)


def _pos_enc_dropout_kernel(x_ref, pos_ref, bits_ref, o_ref, *, threshold, scale):
    # x_ref / pos_ref / bits_ref / o_ref: (tS, D) VMEM blocks.
    val = x_ref[...] + pos_ref[...]
    keep = bits_ref[...] >= jnp.uint32(threshold)   # P(drop) = threshold / 2^32 = p
    o_ref[...] = jnp.where(keep, val * scale, 0.0).astype(o_ref.dtype)


def _pos_enc_kernel(x_ref, pos_ref, o_ref):
    o_ref[...] = (x_ref[...] + pos_ref[...]).astype(o_ref.dtype)


def positional_encoding(enc_inputs, pos_table, *, p=0.1, training=True,
                        rng_key=None, seq_tile=512):
    """enc_inputs: (B, S, D); pos_table: (max_len, D) float32; rng_key for dropout."""
    B, S, D = enc_inputs.shape
    pos_slice = pos_table[:S, :]                      # glue: static slice in JAX

    # Row-tile size: big tiles for HBM-bandwidth efficiency; full S if it fits.
    if S <= seq_tile:
        tS = S
    else:
        tS = (seq_tile // 8) * 8                      # keep (8,128) tiling constraint
    grid = (B, pl.cdiv(S, tS))

    x_spec = pl.BlockSpec((None, tS, D), lambda b, s: (b, s, 0))
    pos_spec = pl.BlockSpec((tS, D), lambda b, s: (s, 0))
    out_spec = pl.BlockSpec((None, tS, D), lambda b, s: (b, s, 0))

    use_dropout = bool(training) and float(p) > 0.0
    if use_dropout:
        if rng_key is None:
            rng_key = jax.random.PRNGKey(0)
        # Random bits generated outside the kernel (portable: no TPU-only PRNG
        # primitives), consumed with an integer threshold compare inside.
        bits = jax.random.bits(rng_key, (B, S, D), dtype=jnp.uint32)
        threshold = min(int(round(float(p) * (2.0 ** 32))), 2 ** 32 - 1)
        kernel = functools.partial(
            _pos_enc_dropout_kernel,
            threshold=threshold,
            scale=1.0 / (1.0 - float(p)),
        )
        in_specs = [x_spec, pos_spec, x_spec]         # bits tiled like x
        args = (enc_inputs, pos_slice, bits)
    else:
        kernel = _pos_enc_kernel
        in_specs = [x_spec, pos_spec]
        args = (enc_inputs, pos_slice)

    return pl.pallas_call(
        kernel,
        out_shape=jax.ShapeDtypeStruct((B, S, D), enc_inputs.dtype),
        grid=grid,
        in_specs=in_specs,
        out_specs=out_spec,
        compiler_params=pltpu.CompilerParams(
            dimension_semantics=("parallel", "parallel"),
        ),
    )(*args)


if __name__ == "__main__":
    # Small shapes consistent with the module: d_model=192 (module global),
    # batch=2, seq_len=16, max_len=64.
    B, S, D, MAX_LEN = 2, 16, 192, 64
    P = 0.1

    key = jax.random.PRNGKey(0)
    k_x, k_drop = jax.random.split(key)
    x = jax.random.normal(k_x, (B, S, D), dtype=jnp.float32)
    pos_table = jnp.asarray(_pos_table_np(D, MAX_LEN))

    # Training-mode path (fused add + inverted dropout).
    out_train = positional_encoding(x, pos_table, p=P, training=True, rng_key=k_drop)
    out_train = jax.block_until_ready(out_train)
    assert out_train.shape == (B, S, D) and out_train.dtype == jnp.float32

    # Eval-mode path (identity dropout) — verify against a pure-JAX reference.
    out_eval = positional_encoding(x, pos_table, p=P, training=False)
    out_eval = jax.block_until_ready(out_eval)
    ref = x + pos_table[:S, :][None, :, :]
    np.testing.assert_allclose(np.asarray(out_eval), np.asarray(ref), rtol=1e-6, atol=1e-6)

    # Training-mode sanity: surviving elements equal (x + pos) / (1 - p), rest are 0.
    scaled_ref = np.asarray(ref) / (1.0 - P)
    out_np = np.asarray(out_train)
    kept = out_np != 0.0
    np.testing.assert_allclose(out_np[kept], scaled_ref[kept], rtol=1e-5, atol=1e-5)

    print("KERNEL_OK")
</pallas_src>

<mosaic_0001>
module attributes {stable_mosaic.version = 11 : i64} {
  func.func @_pos_enc_dropout_kernel(%arg0: i32, %arg1: i32, %arg2: memref<1x16x192xf32, #tpu.memory_space<vmem>>, %arg3: memref<16x192xf32, #tpu.memory_space<vmem>>, %arg4: memref<1x16x192xi32, #tpu.memory_space<vmem>>, %arg5: memref<1x16x192xf32, #tpu.memory_space<vmem>>) attributes {dimension_semantics = [#tpu.dimension_semantics<parallel>, #tpu.dimension_semantics<parallel>], iteration_bounds = array<i64: 2, 1>, scalar_prefetch = 0 : i64, scratch_operands = 0 : i64, tpu.core_type = #tpu.core_type<tc>, window_params = [{transform_indices = @transform_0, window_bounds = array<i64: 1, 16, 192>}, {transform_indices = @transform_1, window_bounds = array<i64: 16, 192>}, {transform_indices = @transform_2, window_bounds = array<i64: 1, 16, 192>}, {transform_indices = @transform_3, window_bounds = array<i64: 1, 16, 192>}]} {
    %c0 = arith.constant 0 : index
    %c0_0 = arith.constant 0 : index
    %c0_1 = arith.constant 0 : index
    %0 = vector.load %arg2[%c0, %c0_0, %c0_1] : memref<1x16x192xf32, #tpu.memory_space<vmem>>, vector<1x16x192xf32>
    %1 = vector.shape_cast %0 : vector<1x16x192xf32> to vector<16x192xf32>
    %c0_2 = arith.constant 0 : index
    %c0_3 = arith.constant 0 : index
    %2 = vector.load %arg3[%c0_2, %c0_3] : memref<16x192xf32, #tpu.memory_space<vmem>>, vector<16x192xf32>
    %3 = arith.addf %1, %2 : vector<16x192xf32>
    %c0_4 = arith.constant 0 : index
    %c0_5 = arith.constant 0 : index
    %c0_6 = arith.constant 0 : index
    %4 = vector.load %arg4[%c0_4, %c0_5, %c0_6] : memref<1x16x192xi32, #tpu.memory_space<vmem>>, vector<1x16x192xi32>
    %5 = vector.shape_cast %4 : vector<1x16x192xi32> to vector<16x192xi32>
    %c429496730_i32 = arith.constant 429496730 : i32
    %6 = vector.broadcast %c429496730_i32 : i32 to vector<16x192xi32>
    %7 = arith.cmpi uge, %5, %6 : vector<16x192xi32>
    %cst = arith.constant 1.11111116 : f32
    %8 = vector.broadcast %cst : f32 to vector<16x192xf32>
    %9 = arith.mulf %3, %8 : vector<16x192xf32>
    %cst_7 = arith.constant 0.000000e+00 : f32
    %10 = vector.broadcast %cst_7 : f32 to vector<16x192xf32>
    %11 = arith.select %7, %9, %10 : vector<16x192xi1>, vector<16x192xf32>
    %c0_8 = arith.constant 0 : index
    %c0_9 = arith.constant 0 : index
    %c0_10 = arith.constant 0 : index
    %12 = vector.load %arg5[%c0_8, %c0_9, %c0_10] : memref<1x16x192xf32, #tpu.memory_space<vmem>>, vector<1x16x192xf32>
    %13 = vector.shape_cast %12 : vector<1x16x192xf32> to vector<16x192xf32>
    %14 = vector.shape_cast %11 : vector<16x192xf32> to vector<1x16x192xf32>
    tpu.vector_store %arg5[%c0_8, %c0_9, %c0_10], %14 {strides = array<i32>} : memref<1x16x192xf32, #tpu.memory_space<vmem>>, vector<1x16x192xf32>,
    return
  }
  func.func @transform_0(%arg0: i32, %arg1: i32) -> (i32, i32, i32) {
    %c0_i32 = arith.constant 0 : i32
    %c0_i32_0 = arith.constant 0 : i32
    return %arg0, %arg1, %c0_i32 : i32, i32, i32
  }
  func.func @transform_1(%arg0: i32, %arg1: i32) -> (i32, i32) {
    %c0_i32 = arith.constant 0 : i32
    %c0_i32_0 = arith.constant 0 : i32
    return %arg1, %c0_i32 : i32, i32
  }
  func.func @transform_2(%arg0: i32, %arg1: i32) -> (i32, i32, i32) {
    %c0_i32 = arith.constant 0 : i32
    %c0_i32_0 = arith.constant 0 : i32
    return %arg0, %arg1, %c0_i32 : i32, i32, i32
  }
  func.func @transform_3(%arg0: i32, %arg1: i32) -> (i32, i32, i32) {
    %c0_i32 = arith.constant 0 : i32
    %c0_i32_0 = arith.constant 0 : i32
    return %arg0, %arg1, %c0_i32 : i32, i32, i32
  }
}

</mosaic_0001>

<bundles_post_ra>
// kernel: tpu_custom_call.1
= control target key start
LH: loop header
LB: loop body
LE: loop exit
PB: predicated region body
PF: predicated region fallthrough
CT: control target
= control target key end

     0   :  { %8 = vsyncpa [#allocation3], 0  ;;  %s1049_s0 = inlined_call_operand.hbm [shape: f32[2,16,192], index: 0, kind: input, shape index: {}]   ;;  %s1050_s1 = inlined_call_operand.hbm [shape: f32[16,192], index: 1, kind: input, shape index: {}]   ;;  %s1051_s2 = inlined_call_operand.hbm [shape: u32[2,16,192], index: 2, kind: input, shape index: {}]   ;;  %s1052_s3 = inlined_call_operand.hbm [shape: f32[2,16,192], index: 3, kind: output, shape index: {}]  }
   0x1   :  { %10 = vsyncpa [#allocation3 + $0x1], 0 }
   0x2   :  { %11 = vsyncpa [#allocation6], 0 }
   0x3   :  { %12 = vsyncpa [#allocation4], 0 }
   0x4   :  { %14 = vsyncpa [#allocation4 + $0x1], 0  ;;  %s764_s12 = smov 0   ;;  %s766_s13 = smov 0  }
   0x5   :  { %s768_s14 = smov 0   ;;  %s770_s15 = smov 0  }
   0x6   :  { %s772_s16 = smov 0   ;;  %s774_s17 = smov 0  }
   0x7 LB: > { %s32_s18 = sadd.s32 1, %s730_s16  ;;  %s41_s19 = sadd.s32 1, %s722_s14  ;;  %s734_s17 = sphi %s774_s17, %s20_s17   ;;  %s730_s16 = sphi %s772_s16, %s1077_s16   ;;  %s726_s15 = sphi %s770_s15, %s1076_s15   ;;  %s722_s14 = sphi %s768_s14, %s1075_s14   ;;  %s718_s13 = sphi %s766_s13, %s1074_s13   ;;  %s714_s12 = sphi %s764_s12, %s1073_s12  }
   0x8   : > { %p34_p0 = scmp.ge.s32.totalorder %s32_s18, 2  ;;  %p48_p1 = scmp.ne.s32.totalorder %s722_s14, %s718_s13 }
   0x9   : > { %p49_p2 = scmp.eq.s32.totalorder %s734_s17, 0  ;;  %p500_p6 = scmp.lt.s32.totalorder %s734_s17, 2 }
   0xa   : > { %s1079_s18 = smov (%p34_p0, %s32_s18), 0  ;;  %s177_s22 = sand.u32 1, %s734_s17  }
   0xb   : > { %p804_p3 = por %p49_p2, %p48_p1  ;;  %s36_s21 = ssub.s32 %s730_s16, %s1079_s18 }
   0xc   : > { %p39_p5 = scmp.eq.s32.totalorder %s36_s21, 0  ;;  %s179_s23 = sand.u32 1, %s722_s14  }
   0xd   : > { %s817_s25 = sshll.u32 %s179_s23, 5  ;;  %s471_s26 = sshll.u32 %s730_s16, 9 }
   0xe   : > { %s815_s24 = scalar_select %p39_p5, %s722_s14, %s41_s19  }
   0xf   : > { %s823_s29 = scalar_lea.hbm %s1049_s0, %s471_s26  ;;  %s181_s30 = scalar_lea.vmem [#allocation2], %s817_s25 }
  0x10   : > { %s191_s4 = sshll.u32 %s181_s30, 4  ;;  %p830_p7 = pnand %p500_p6, %p804_p3  ;;  %s826_s4 = int_to_ptr.vmem [resolvable:$true] %s191_s4 }
  0x11   : > { %s837_s8 = scalar_lea.hbm %s1051_s2, %s471_s26  ;;  %s839_s9 = scalar_lea.sflag [#allocation3], %s177_s22 }
  0x12   : > { %s556_s10 = scalar_lea.hbm %s823_s29, 512  ;;  %p558_p9 = pneg %p830_p7 }
  0x13   : > { %p557_p8 = scmp.ne.s32.totalorder %s823_s29, %s556_s10  ;;  %s561_s20 = scalar_lea.hbm %s1049_s0, 1024 }
  0x14   : > { %p562_p12 = scmp.lt.u32.totalorder %s823_s29, %s1049_s0  ;;  %p563_p13 = scmp.lt.u32.totalorder %s561_s20, %s556_s10 }
  0x15   : > { %p559_p10 = pnand %p558_p9, %p557_p8  ;;  %p565_p2 = scmp.lt.u32.totalorder %s556_s10, %s823_s29 }
  0x16   : > { %p564_p0 = por %p563_p13, %p562_p12 }
  0x17   : > { %p560_p11 = pneg %p559_p10 }
  0x18   : > { %p566_p3 = por %p565_p2, %p564_p0 }
  0x1a   : > { %p567_p5 = pnand %p566_p3, %p560_p11 }
  0x1c   : > { %570 = shalt.err (!%p567_p5)
}
  0x1d   : > { %s571_s22 = scalar_lea.vmem %s826_s4, 512  ;;  %s736_s26 = smov [#allocation2]  }
  0x1e   : > { %p572_p6 = scmp.ne.s32.totalorder %s826_s4, %s571_s22  ;;  %s576_s27 = sshll.u32 %s736_s26, 4  ;;  %s577_s27 = int_to_ptr.vmem [resolvable:$false] %s576_s27 }
  0x1f   : > { %s578_s28 = scalar_lea.vmem %s577_s27, 1024  ;;  %p579_p4 = scmp.lt.s32.totalorder %s826_s4, %s577_s27 }
  0x20   : > { %p574_p8 = pnand %p572_p6, %p558_p9  ;;  %p580_p12 = scmp.lt.s32.totalorder %s578_s28, %s571_s22 }
  0x22   : > { %p575_p10 = pneg %p574_p8  ;;  %p581_p13 = por %p580_p12, %p579_p4 }
  0x24   : > { %p582_p0 = pnand %p581_p13, %p575_p10 }
  0x26   : > { %585 = shalt.err (!%p582_p0)
}
  0x27   : > { %s737_s30 = smov 256   ;;  %s738_s6 = smov 16  }
  0x28   : > { %491 = dma.hbm_to_vmem [thread:$0]  (!%p830_p7), %s823_s29, 512, %s826_s4, %s839_s9, %s737_s30, %s737_s30, %s738_s6  }
  0x29   : > { %s205_s7 = scalar_lea.vmem [#allocation7], %s817_s25  ;;  %s872_s11 = sadd.s32 4294967295, %s734_s17  }
  0x2a   : > { %s215_s10 = sshll.u32 %s205_s7, 4  ;;  %s451_s19 = sadd.s32 4294967294, %s734_s17   ;;  %s898_s10 = int_to_ptr.vmem [resolvable:$true] %s215_s10 }
  0x2b   : > { %p54_p4 = scmp.ne.s32.totalorder %s718_s13, %s714_s12  ;;  %p1053_p11 = scmp.eq.s32.totalorder %s872_s11, 0 }
  0x2c   : > { %p134_p2 = scmp.eq.s32.totalorder %s872_s11, 1  ;;  %p140_p3 = scmp.eq.s32.totalorder %s451_s19, 1 }
  0x2d   : > { %p452_p5 = scmp.ge.s32.totalorder %s734_s17, 1  ;;  %p882_p6 = por %p1053_p11, %p54_p4 }
  0x2e   : > { %p889_p8 = por %p134_p2, %p48_p1  ;;  %p893_p10 = por %p140_p3, %p54_p4 }
  0x2f   : > { %s1059_s29 = scalar_select %p882_p6, 1, 0 }
  0x30   : > { %s1060_s25 = scalar_select %p889_p8, 1, 0 }
  0x31   : > { %s1061_s4 = scalar_select %p893_p10, 1, 0 }
  0x32   : > { %p147_p12 = scmp.lt.s32.totalorder %s734_s17, 3  ;;  %s739_s21 = smov [#allocation5]  }
  0x33   : > { %s904_s23 = sshll.u32 %s739_s21, 4  ;;  %s586_s22 = scalar_lea.hbm %s837_s8, 512  ;;  %s164_s23 = int_to_ptr.vmem [resolvable:$true] %s904_s23 }
  0x34   : > { %p900_p13 = pnand %p452_p5, %p147_p12  ;;  %p587_p0 = scmp.ne.s32.totalorder %s837_s8, %s586_s22 }
  0x35   : > { %s591_s28 = scalar_lea.hbm %s1051_s2, 1024  ;;  %p592_p3 = scmp.lt.u32.totalorder %s837_s8, %s1051_s2 }
  0x36   : > { %s1062_s20 = scalar_select %p900_p13, 1, 0 }
  0x37   : > { %p589_p4 = pnand %p587_p0, %p558_p9  ;;  %p593_p5 = scmp.lt.u32.totalorder %s591_s28, %s586_s22 }
  0x38   : > { %p595_p11 = scmp.lt.u32.totalorder %s586_s22, %s837_s8 }
  0x39   : > { %p590_p2 = pneg %p589_p4  ;;  %p594_p12 = por %p593_p5, %p592_p3 }
  0x3b   : > { %p596_p10 = por %p595_p11, %p594_p12 }
  0x3d   : > { %p597_p8 = pnand %p596_p10, %p590_p2 }
  0x3f   : > { %600 = shalt.err (!%p597_p8)
}
  0x40   : > { %s601_s21 = scalar_lea.vmem %s898_s10, 512  ;;  %s740_s26 = smov [#allocation7]  }
  0x41   : > { %p602_p0 = scmp.ne.s32.totalorder %s898_s10, %s601_s21  ;;  %s606_s27 = sshll.u32 %s740_s26, 4  ;;  %s607_s27 = int_to_ptr.vmem [resolvable:$false] %s606_s27 }
  0x42   : > { %s608_s7 = scalar_lea.vmem %s607_s27, 1024  ;;  %p609_p6 = scmp.lt.s32.totalorder %s898_s10, %s607_s27 }
  0x43   : > { %p604_p4 = pnand %p602_p0, %p558_p9  ;;  %p610_p3 = scmp.lt.s32.totalorder %s608_s7, %s601_s21 }
  0x45   : > { %p605_p1 = pneg %p604_p4  ;;  %p611_p5 = por %p610_p3, %p609_p6 }
  0x47   : > { %p612_p11 = pnand %p611_p5, %p605_p1 }
  0x49   : > { %615 = shalt.err (!%p612_p11)
}
  0x4a   : > { %494 = dma.hbm_to_vmem [thread:$0]  (!%p830_p7), %s837_s8, 512, %s898_s10, %s839_s9, %s737_s30, %s737_s30, %s738_s6  }
  0x4b   : > { %p1063_p9 = scmp.eq.s32.totalorder %s872_s11, 0  ;;  %p1064_p8 = pneg %p900_p13 }
  0x4c   : > { %s616_s19 = scalar_lea.hbm %s1050_s1, 512 }
  0x4d   : > { %p941_p10 = pnand %p1064_p8, %p1063_p9  ;;  %p617_p6 = scmp.ne.s32.totalorder %s1050_s1, %s616_s19 }
  0x4e   : > { %p623_p12 = scmp.lt.u32.totalorder %s616_s19, %s1050_s1 }
  0x4f   : > { %p618_p1 = pneg %p941_p10 }
  0x51   : > { %p619_p7 = pnand %p618_p1, %p617_p6 }
  0x53   : > { %p620_p2 = pneg %p619_p7 }
  0x55   : > { %p625_p0 = pnand %p623_p12, %p620_p2 }
  0x57   : > { %628 = shalt.err (!%p625_p0)
}
  0x58   : > { %s629_s10 = scalar_lea.vmem %s164_s23, 512  ;;  %p637_p11 = scmp.lt.s32.totalorder %s164_s23, %s164_s23 }
  0x59   : > { %p630_p4 = scmp.ne.s32.totalorder %s164_s23, %s629_s10  ;;  %p638_p9 = scmp.lt.s32.totalorder %s629_s10, %s629_s10 }
  0x5b   : > { %p632_p3 = pnand %p630_p4, %p618_p1  ;;  %p639_p8 = por %p638_p9, %p637_p11 }
  0x5d   : > { %p633_p5 = pneg %p632_p3 }
  0x5f   : > { %p640_p13 = pnand %p639_p8, %p633_p5 }
  0x61   : > { %643 = shalt.err (!%p640_p13)
}
  0x62   : > { %487 = dma.hbm_to_vmem [thread:$0]  (!%p941_p10), %s1050_s1, 512, %s164_s23, [#allocation6], %s737_s30, %s737_s30, %s738_s6  }
  0x63   : > { %p1066_p6 = scmp.ne.s32.totalorder %s1062_s20, 0 }
  0x64   : > { %s229_s28 = sand.u32 (!%p1066_p6), 1, %s872_s11   ;;  %s231_s5 = sand.u32 (!%p1066_p6), 1, %s718_s13  }
  0x65   : > { %227 = sbr.rel (%p1066_p6) target bundleno = 143 (0x8f), region = 32  ;;  %s462_s19 = sshll.u32 (!%p1066_p6), %s231_s5, 5 }
  0x66   : > { %s230_s21 = scalar_lea.sflag (!%p1066_p6), [#allocation3], %s229_s28  ;;  %s233_s22 = scalar_lea.vmem (!%p1066_p6), [#allocation2], %s462_s19 }
  0x67   : > { %p1067_p13 = scmp.ne.s32.totalorder (!%p1066_p6), %s1059_s29, 0 }
  0x6c   : > { %697 = dma.done.wait (%p1067_p13), %s230_s21, 512  }
  0x6d   : > { %699 = vsyncadd (%p1067_p13), %s230_s21, 4294966784  ;;  %p1068_p10 = scmp.eq.s32.totalorder %s872_s11, 0 }
  0x6f   : > { %701 = dma.done.wait (%p1068_p10), [#allocation6], 512   ;;  %p1069_p1 = pmov %p1068_p10 }
  0x70   : > { %s246_s30 = scalar_lea.vmem [#allocation7], %s462_s19 }
  0x71   : > { %703 = vsyncadd (%p1069_p1), [#allocation6], 4294966784 }
  0x72   : > { %705 = dma.done.wait (%p1067_p13), %s230_s21, 512  }
  0x73   : > { %707 = vsyncadd (%p1067_p13), %s230_s21, 4294966784  ;;  %v278_v0 = vld [vmem:[%s233_s22] sm:$0xff]  ;;  %s982_s6 = scalar_lea.vmem [#allocation8], %s462_s19  ;;  %v279_v4 = vld [vmem:[%s233_s22 + $0x8] sm:$0xff]  ;;  %s473_s11 = sshll.u32 %s726_s15, 9  ;;  %vm307_vm2 = vcmask 523264  }
  0x74   : > { %v282_v1 = vld [vmem:[#allocation5] sm:$0xff]  ;;  %s328_s20 = sshll.u32 %s982_s6, 4  ;;  %v283_v5 = vld [vmem:[#allocation5 + $0x8] sm:$0xff]  ;;  %v280_v8 = vld [vmem:[%s233_s22 + $0x10] sm:$0xff]  ;;  %s993_s23 = scalar_lea.hbm %s1052_s3, %s473_s11  ;;  %s988_s20 = int_to_ptr.vmem [resolvable:$true] %s328_s20 }
  0x75   : > { %v290_v2 = vld [vmem:[%s246_s30] sm:$0xff]  ;;  %v286_v3 = vadd.f32 %v282_v1, %v278_v0  ;;  %v291_v6 = vld [vmem:[%s246_s30 + $0x8] sm:$0xff]  ;;  %v287_v7 = vadd.f32 %v283_v5, %v279_v4  ;;  %v284_v9 = vld [vmem:[#allocation5 + $0x10] sm:$0xff]  ;;  %s1002_s26 = scalar_lea.sflag [#allocation4], %s231_s5  ;;  %s644_s8 = scalar_lea.vmem %s988_s20, 512 }
  0x76   : > { %vm294_vm0 = vcmp.ge.u32.totalorder %v290_v2, 429496730  ;;  %v292_v10 = vld [vmem:[%s246_s30 + $0x10] sm:$0xff]  ;;  %vm295_vm1 = vcmp.ge.u32.totalorder %v291_v6, 429496730  ;;  %v288_v12 = vadd.f32 %v284_v9, %v280_v8  ;;  %v281_v13 = vld [vmem:[%s233_s22 + $0x18] sm:$0xff]  ;;  %p645_p7 = scmp.ne.s32.totalorder %s988_s20, %s644_s8 }
  0x77   : > { %v298_v11 = vmul.f32 1.1111112, %v286_v3  ;;  %v285_v14 = vld [vmem:[#allocation5 + $0x18] sm:$0xff]  ;;  %v299_v15 = vmul.f32 1.1111112, %v287_v7  ;;  %p1070_p2 = scmp.ne.s32.totalorder %s1060_s25, 0 }
  0x78   : > { %vm296_vm3 = vcmp.ge.u32.totalorder %v292_v10, 429496730  ;;  %v289_v16 = vadd.f32 %v285_v14, %v281_v13  ;;  %v293_v17 = vld [vmem:[%s246_s30 + $0x18] sm:$0xff]  ;;  %v300_v19 = vmul.f32 1.1111112, %v288_v12  ;;  %s741_s9 = smov [#allocation8]  }
  0x79   : > { %v302_v18 = vsel %vm294_vm0, %v298_v11, 0.0  ;;  %vm297_vm4 = vcmp.ge.u32.totalorder %v293_v17, 429496730  ;;  %v303_v20 = vsel %vm295_vm1, %v299_v15, 0.0  ;;  %p646_p12 = pnand %p645_p7, %p1070_p2  ;;  %s648_s10 = sshll.u32 %s741_s9, 4  ;;  %s649_s10 = int_to_ptr.vmem [resolvable:$false] %s648_s10 }
  0x7a   : > { %306 = vst [vmem:[%s982_s6] sm:$0xff] %v302_v18  ;;  %v301_v21 = vmul.f32 1.1111112, %v289_v16  ;;  %308 = vst.msk [vmem:[%s982_s6 + $0x8] sm:$0xff] %vm307_vm2, %v303_v20  ;;  %v304_v22 = vsel %vm296_vm3, %v300_v19, 0.0  ;;  %s650_s27 = scalar_lea.vmem %s649_s10, 1024  ;;  %p651_p4 = scmp.lt.s32.totalorder %s988_s20, %s649_s10 }
  0x7b   : > { %309 = vst [vmem:[%s982_s6 + $0x10] sm:$0xff] %v304_v22  ;;  %p647_p0 = pneg %p646_p12  ;;  %p652_p3 = scmp.lt.s32.totalorder %s650_s27, %s644_s8 }
  0x7c   : > { %v305_v23 = vsel %vm297_vm4, %v301_v21, 0.0 }
  0x7d   : > { %310 = vst.msk [vmem:[%s982_s6 + $0x18] sm:$0xff] %vm307_vm2, %v305_v23  ;;  %p653_p5 = por %p652_p3, %p651_p4 }
  0x7f   : > { %p654_p11 = pnand %p653_p5, %p647_p0 }
  0x81   : > { %657 = shalt.err (!%p654_p11)
}
  0x82   : > { %s658_s7 = scalar_lea.hbm %s993_s23, 512  ;;  %s662_s19 = scalar_lea.hbm %s1052_s3, 1024 }
  0x83   : > { %p659_p9 = scmp.ne.s32.totalorder %s993_s23, %s658_s7  ;;  %p663_p13 = scmp.lt.u32.totalorder %s993_s23, %s1052_s3 }
  0x84   : > { %p664_p10 = scmp.lt.u32.totalorder %s662_s19, %s658_s7  ;;  %p666_p7 = scmp.lt.u32.totalorder %s658_s7, %s993_s23 }
  0x85   : > { %p660_p8 = pnand %p659_p9, %p1070_p2 }
  0x86   : > { %p665_p1 = por %p664_p10, %p663_p13 }
  0x87   : > { %p661_p6 = pneg %p660_p8 }
  0x88   : > { %p667_p12 = por %p666_p7, %p665_p1 }
  0x8a   : > { %p668_p0 = pnand %p667_p12, %p661_p6 }
  0x8c   : > { %671 = shalt.err (!%p668_p0)
}
  0x8d   : > { %s742_s30 = smov 256   ;;  %s743_s6 = smov 16  }
  0x8e   : > { %482 = dma.vmem_to_hbm [thread:$0]  (%p1070_p2), %s988_s20, 512, %s993_s23, %s1002_s26, %s742_s30, %s742_s30, %s743_s6  }
  0x8f PF: > { %s343_s11 = sand.u32 1, %s714_s12   ;;  %p1071_p4 = scmp.ne.s32.totalorder %s1061_s4, 0 }
  0x90   : > { %p1072_p3 = scmp.ge.s32.totalorder %s734_s17, 2  ;;  %s344_s15 = scalar_lea.sflag [#allocation4], %s343_s11 }
  0x92   : > { %p496_p5 = pnand %p1072_p3, %p1071_p4 }
  0x94   : > { %709 = dma.done.wait (!%p496_p5), %s344_s15, 512  }
  0x95   : > { %711 = vsyncadd (!%p496_p5), %s344_s15, 4294966784  ;;  %s20_s17 = sadd.s32 1, %s734_s17   ;;  %s1073_s12 = smov %s718_s13 }
  0x96   : > { %p17_p11 = scmp.ge.s32.totalorder %s20_s17, 4   ;;  %s1074_s13 = smov %s722_s14 }
  0x97   : > { %s1075_s14 = smov %s815_s24  ;;  %s1076_s15 = smov %s730_s16 }
  0x98   : > { %s1077_s16 = smov %s1079_s18  ;;  %19 = sbr.rel (!%p17_p11) target bundleno = 7 (0x7), region = 93 }
  0x9f   :  { %349 = vsyncpa [#allocation3], 1 }
  0xa0   :  { %351 = vsyncpa [#allocation3 + $0x1], 1 }
  0xa1   :  { %352 = vsyncpa [#allocation6], 1 }
  0xa2   :  { %353 = vsyncpa [#allocation4], 1 }
  0xa3   :  { %355 = vsyncpa [#allocation4 + $0x1], 1 }

</bundles_post_ra>
